<compile_context>
chip_gen: v6e
topology: v6e:2x2x1
jax: 0.10.0
libtpu: 0.0.40
codegen_flags: <defaults>
</compile_context>

<pallas_src>
import jax
import jax.numpy as jnp
from jax import lax
from jax.experimental import pallas as pl
from jax.experimental.pallas import tpu as pltpu

IN_FEATURES = 9
HIDDEN = 16
LANES = 128                       # inner batch chunk == one vreg lane group
STACK = IN_FEATURES * HIDDEN      # 144


def titanic_qt_kernel(x_ref, ws_ref, cb_ref, wfb_ref, o_ref):
    """One grid step = one (tb, 9) batch block, processed in static 128-lane chunks.

      x_ref   (tb, 9)            batch rows, natural layout (batch on sublanes)
      ws_ref  (144, 9)           w[j,i] scattered so the matmul yields w[j,i]*x[b,i]
      cb_ref  (144, 128)         (1 - w[j,i]) pre-broadcast to lane width
      wfb_ref (1, 17)            fc1 weight (16 cols) | fc1 bias (1 col)
      o_ref   (1, tb//128, 128)  one dense 128-lane row per chunk
    """
    n_chunks = o_ref.shape[1]

    ws = ws_ref[...]                          # (144, 9)  stationary MXU operand
    wf = wfb_ref[:, :HIDDEN]                  # (1, 16)
    bf = wfb_ref[:, HIDDEN:HIDDEN + 1]        # (1, 1)

    for c in range(n_chunks):                 # static unroll; all offsets static
        off = c * LANES
        xc = x_ref[off:off + LANES, :]        # (128, 9)  batch on sublanes

        # MXU: transpose + per-feature broadcast + w*x in one matmul.
        #   t[i*16 + j, b] = w[j, i] * x[b, i]   (batch now on the 128-lane axis)
        t = lax.dot_general(ws, xc, (((1,), (1,)), ((), ())),
                            preferred_element_type=jnp.float32)      # (144, 128)

        # Quasi product layer: h[j, b] = prod_i (1 - w[j,i] + w[j,i] * x[b,i]).
        h = t[0:HIDDEN, :] + cb_ref[0:HIDDEN, :]
        for i in range(1, IN_FEATURES):
            r = i * HIDDEN
            h = h * (t[r:r + HIDDEN, :] + cb_ref[r:r + HIDDEN, :])

        # fc1: Linear(16 -> 1) on the MXU, tanh on the EUP, dense 128-lane store.
        z = jnp.dot(wf, h, preferred_element_type=jnp.float32) + bf  # (1, 128)
        o_ref[0, c:c + 1, :] = jnp.tanh(z)


def _round_up(x, m):
    return ((x + m - 1) // m) * m


def _choose_tile(batch, tb_max):
    """Batch tile: multiple of 128, large enough to amortise per-grid-step overhead,
    but giving >= 2 grid blocks for larger batches (both TensorCores on v7x)."""
    b = _round_up(max(batch, 1), LANES)
    if b <= LANES:
        return LANES
    if b <= tb_max:
        return min(_round_up((b + 1) // 2, LANES), tb_max)
    return tb_max


def titanic_qt_net_pallas(x, params, *, tb=None, tb_max=4096):
    """x: (B, 9) float32.  Returns (B, 1) float32, matching the PyTorch forward."""
    wq, wf, bf = params                     # (16, 9), (1, 16), (1,)
    B, F = x.shape
    assert F == IN_FEATURES
    x = x.astype(jnp.float32)

    if tb is None:
        tb = _choose_tile(B, tb_max)
    assert tb % LANES == 0 and tb > 0
    n_blocks = pl.cdiv(B, tb)
    rows = tb // LANES

    # Pack the Quasi weights so one MXU matmul against the natural (tb, 9) x tile
    # produces w[j,i] * x[b,i] with batch on the lane axis (no wrapper transpose of x).
    wqT = wq.astype(jnp.float32).T                                          # (9, 16)
    eye = jnp.eye(IN_FEATURES, dtype=jnp.float32)
    wstack = (wqT[:, :, None] * eye[:, None, :]).reshape(STACK, IN_FEATURES)  # (144, 9)
    # Precomputed (1 - w), pre-broadcast to lane width -> plain vreg add in-kernel.
    cbcast = jnp.asarray(
        jnp.broadcast_to((1.0 - wqT).reshape(STACK, 1), (STACK, LANES)), jnp.float32)
    # fc1 weight + bias packed into a single resident slab.
    wfb = jnp.concatenate([wf.astype(jnp.float32).reshape(1, HIDDEN),
                           bf.astype(jnp.float32).reshape(1, 1)], axis=1)   # (1, 17)

    out = pl.pallas_call(
        titanic_qt_kernel,
        out_shape=jax.ShapeDtypeStruct((n_blocks, rows, LANES), jnp.float32),
        grid_spec=pltpu.PrefetchScalarGridSpec(
            num_scalar_prefetch=0,
            grid=(n_blocks,),
            in_specs=[
                pl.BlockSpec((tb, IN_FEATURES), lambda i: (i, 0)),      # x batch tile
                pl.BlockSpec((STACK, IN_FEATURES), lambda i: (0, 0)),   # resident Quasi W
                pl.BlockSpec((STACK, LANES), lambda i: (0, 0)),         # resident 1 - W
                pl.BlockSpec((1, HIDDEN + 1), lambda i: (0, 0)),        # resident fc W|b
            ],
            out_specs=pl.BlockSpec((1, rows, LANES), lambda i: (i, 0, 0)),
        ),
        compiler_params=pltpu.CompilerParams(
            dimension_semantics=("parallel",),   # shard batch blocks across TCs on v7x
        ),
    )(x, wstack, cbcast, wfb)

    return out.reshape(-1)[:B].reshape(B, 1)


def init_params(key):
    """Deterministic init: Quasi weights in [0,1], fc1 with torch nn.Linear bounds."""
    kq, kw, kb = jax.random.split(key, 3)
    wq = jax.random.uniform(kq, (HIDDEN, IN_FEATURES), jnp.float32, 0.0, 1.0)
    bound = 1.0 / (HIDDEN ** 0.5)
    wf = jax.random.uniform(kw, (1, HIDDEN), jnp.float32, -bound, bound)
    bf = jax.random.uniform(kb, (1,), jnp.float32, -bound, bound)
    return wq, wf, bf


def titanic_qt_ref(x, params):
    """Pure-JAX reference of the forward pass (Quasi product layer + Linear + tanh)."""
    wq, wf, bf = params
    terms = 1.0 - wq[None, :, :] + wq[None, :, :] * x[:, None, :]    # (B, 16, 9)
    h = jnp.prod(terms, axis=-1)                                     # (B, 16)
    return jnp.tanh(h @ wf.T + bf)                                   # (B, 1)


if __name__ == "__main__":
    key = jax.random.PRNGKey(0)
    k_params, k_x1, k_x2 = jax.random.split(key, 3)
    params = init_params(k_params)

    # batch=256: divisible case (2 blocks of 128 -> multi-step pipeline / both TCs).
    # batch=613: non-divisible case (tile 384 -> partial last block, 3-chunk inner loop).
    for bsz, kx in ((256, k_x1), (613, k_x2)):
        x = jax.random.uniform(kx, (bsz, IN_FEATURES), dtype=jnp.float32)
        out = jax.block_until_ready(titanic_qt_net_pallas(x, params))
        ref = titanic_qt_ref(x, params)
        assert out.shape == (bsz, 1)
        assert jnp.allclose(out, ref, atol=2e-5, rtol=1e-4), \
            f"mismatch vs. pure-JAX reference at batch={bsz}"

    print("KERNEL_OK")
</pallas_src>

<mosaic_0001>
module attributes {stable_mosaic.version = 11 : i64} {
  func.func @titanic_qt_kernel(%arg0: i32, %arg1: memref<128x9xf32, #tpu.memory_space<vmem>>, %arg2: memref<144x9xf32, #tpu.memory_space<vmem>>, %arg3: memref<144x128xf32, #tpu.memory_space<vmem>>, %arg4: memref<1x17xf32, #tpu.memory_space<vmem>>, %arg5: memref<1x1x128xf32, #tpu.memory_space<vmem>>) attributes {dimension_semantics = [#tpu.dimension_semantics<parallel>], iteration_bounds = array<i64: 2>, scalar_prefetch = 0 : i64, scratch_operands = 0 : i64, tpu.core_type = #tpu.core_type<tc>, window_params = [{transform_indices = @transform_0, window_bounds = array<i64: 128, 9>}, {pipeline_mode = #tpu.pipeline_mode<synchronous>, transform_indices = @transform_1, window_bounds = array<i64: 144, 9>}, {pipeline_mode = #tpu.pipeline_mode<synchronous>, transform_indices = @transform_2, window_bounds = array<i64: 144, 128>}, {pipeline_mode = #tpu.pipeline_mode<synchronous>, transform_indices = @transform_3, window_bounds = array<i64: 1, 17>}, {transform_indices = @transform_4, window_bounds = array<i64: 1, 1, 128>}]} {
    %c0 = arith.constant 0 : index
    %c0_0 = arith.constant 0 : index
    %0 = vector.load %arg2[%c0, %c0_0] : memref<144x9xf32, #tpu.memory_space<vmem>>, vector<144x9xf32>
    %c0_1 = arith.constant 0 : index
    %c0_2 = arith.constant 0 : index
    %1 = vector.load %arg4[%c0_1, %c0_2] : memref<1x17xf32, #tpu.memory_space<vmem>>, vector<1x16xf32>
    %c0_3 = arith.constant 0 : index
    %c16 = arith.constant 16 : index
    %2 = vector.load %arg4[%c0_3, %c16] : memref<1x17xf32, #tpu.memory_space<vmem>>, vector<1x1xf32>
    %c0_4 = arith.constant 0 : index
    %c0_5 = arith.constant 0 : index
    %3 = vector.load %arg1[%c0_4, %c0_5] : memref<128x9xf32, #tpu.memory_space<vmem>>, vector<128x9xf32>
    %cst = arith.constant dense<0.000000e+00> : vector<144x128xf32>
    %4 = tpu.matmul %0, %3, %cst {dimension_numbers = #tpu.dot_dimension_numbers<[1], [1], [0], [0], [0, 0, 1, 0], [], []>} : vector<144x9xf32>, vector<128x9xf32>, vector<144x128xf32> -> vector<144x128xf32>
    %5 = vector.extract_strided_slice %4 {offsets = [0, 0], sizes = [16, 128], strides = [1, 1]} : vector<144x128xf32> to vector<16x128xf32>
    %c0_6 = arith.constant 0 : index
    %c0_7 = arith.constant 0 : index
    %6 = vector.load %arg3[%c0_6, %c0_7] : memref<144x128xf32, #tpu.memory_space<vmem>>, vector<16x128xf32>
    %7 = arith.addf %5, %6 : vector<16x128xf32>
    %8 = vector.extract_strided_slice %4 {offsets = [16, 0], sizes = [16, 128], strides = [1, 1]} : vector<144x128xf32> to vector<16x128xf32>
    %c16_8 = arith.constant 16 : index
    %c0_9 = arith.constant 0 : index
    %9 = vector.load %arg3[%c16_8, %c0_9] : memref<144x128xf32, #tpu.memory_space<vmem>>, vector<16x128xf32>
    %10 = arith.addf %8, %9 : vector<16x128xf32>
    %11 = arith.mulf %7, %10 : vector<16x128xf32>
    %12 = vector.extract_strided_slice %4 {offsets = [32, 0], sizes = [16, 128], strides = [1, 1]} : vector<144x128xf32> to vector<16x128xf32>
    %c32 = arith.constant 32 : index
    %c0_10 = arith.constant 0 : index
    %13 = vector.load %arg3[%c32, %c0_10] : memref<144x128xf32, #tpu.memory_space<vmem>>, vector<16x128xf32>
    %14 = arith.addf %12, %13 : vector<16x128xf32>
    %15 = arith.mulf %11, %14 : vector<16x128xf32>
    %16 = vector.extract_strided_slice %4 {offsets = [48, 0], sizes = [16, 128], strides = [1, 1]} : vector<144x128xf32> to vector<16x128xf32>
    %c48 = arith.constant 48 : index
    %c0_11 = arith.constant 0 : index
    %17 = vector.load %arg3[%c48, %c0_11] : memref<144x128xf32, #tpu.memory_space<vmem>>, vector<16x128xf32>
    %18 = arith.addf %16, %17 : vector<16x128xf32>
    %19 = arith.mulf %15, %18 : vector<16x128xf32>
    %20 = vector.extract_strided_slice %4 {offsets = [64, 0], sizes = [16, 128], strides = [1, 1]} : vector<144x128xf32> to vector<16x128xf32>
    %c64 = arith.constant 64 : index
    %c0_12 = arith.constant 0 : index
    %21 = vector.load %arg3[%c64, %c0_12] : memref<144x128xf32, #tpu.memory_space<vmem>>, vector<16x128xf32>
    %22 = arith.addf %20, %21 : vector<16x128xf32>
    %23 = arith.mulf %19, %22 : vector<16x128xf32>
    %24 = vector.extract_strided_slice %4 {offsets = [80, 0], sizes = [16, 128], strides = [1, 1]} : vector<144x128xf32> to vector<16x128xf32>
    %c80 = arith.constant 80 : index
    %c0_13 = arith.constant 0 : index
    %25 = vector.load %arg3[%c80, %c0_13] : memref<144x128xf32, #tpu.memory_space<vmem>>, vector<16x128xf32>
    %26 = arith.addf %24, %25 : vector<16x128xf32>
    %27 = arith.mulf %23, %26 : vector<16x128xf32>
    %28 = vector.extract_strided_slice %4 {offsets = [96, 0], sizes = [16, 128], strides = [1, 1]} : vector<144x128xf32> to vector<16x128xf32>
    %c96 = arith.constant 96 : index
    %c0_14 = arith.constant 0 : index
    %29 = vector.load %arg3[%c96, %c0_14] : memref<144x128xf32, #tpu.memory_space<vmem>>, vector<16x128xf32>
    %30 = arith.addf %28, %29 : vector<16x128xf32>
    %31 = arith.mulf %27, %30 : vector<16x128xf32>
    %32 = vector.extract_strided_slice %4 {offsets = [112, 0], sizes = [16, 128], strides = [1, 1]} : vector<144x128xf32> to vector<16x128xf32>
    %c112 = arith.constant 112 : index
    %c0_15 = arith.constant 0 : index
    %33 = vector.load %arg3[%c112, %c0_15] : memref<144x128xf32, #tpu.memory_space<vmem>>, vector<16x128xf32>
    %34 = arith.addf %32, %33 : vector<16x128xf32>
    %35 = arith.mulf %31, %34 : vector<16x128xf32>
    %36 = vector.extract_strided_slice %4 {offsets = [128, 0], sizes = [16, 128], strides = [1, 1]} : vector<144x128xf32> to vector<16x128xf32>
    %c128 = arith.constant 128 : index
    %c0_16 = arith.constant 0 : index
    %37 = vector.load %arg3[%c128, %c0_16] : memref<144x128xf32, #tpu.memory_space<vmem>>, vector<16x128xf32>
    %38 = arith.addf %36, %37 : vector<16x128xf32>
    %39 = arith.mulf %35, %38 : vector<16x128xf32>
    %cst_17 = arith.constant dense<0.000000e+00> : vector<1x128xf32>
    %40 = tpu.matmul %1, %39, %cst_17 {dimension_numbers = #tpu.dot_dimension_numbers<[1], [0], [0], [1], [0, 0, 1, 1], [], []>} : vector<1x16xf32>, vector<16x128xf32>, vector<1x128xf32> -> vector<1x128xf32>
    %41 = vector.broadcast %2 : vector<1x1xf32> to vector<1x128xf32>
    %42 = arith.addf %40, %41 : vector<1x128xf32>
    %43 = math.tanh %42 : vector<1x128xf32>
    %c0_18 = arith.constant 0 : index
    %c0_19 = arith.constant 0 : index
    %c0_20 = arith.constant 0 : index
    %44 = vector.load %arg5[%c0_18, %c0_19, %c0_20] : memref<1x1x128xf32, #tpu.memory_space<vmem>>, vector<1x1x128xf32>
    %45 = vector.shape_cast %44 : vector<1x1x128xf32> to vector<1x128xf32>
    %46 = vector.shape_cast %43 : vector<1x128xf32> to vector<1x1x128xf32>
    tpu.vector_store %arg5[%c0_18, %c0_19, %c0_20], %46 {strides = array<i32>} : memref<1x1x128xf32, #tpu.memory_space<vmem>>, vector<1x1x128xf32>,
    return
  }
  func.func @transform_0(%arg0: i32) -> (i32, i32) {
    %c0_i32 = arith.constant 0 : i32
    %c0_i32_0 = arith.constant 0 : i32
    return %arg0, %c0_i32 : i32, i32
  }
  func.func @transform_1(%arg0: i32) -> (i32, i32) {
    %c0_i32 = arith.constant 0 : i32
    %c0_i32_0 = arith.constant 0 : i32
    %c0_i32_1 = arith.constant 0 : i32
    return %c0_i32, %c0_i32_0 : i32, i32
  }
  func.func @transform_2(%arg0: i32) -> (i32, i32) {
    %c0_i32 = arith.constant 0 : i32
    %c0_i32_0 = arith.constant 0 : i32
    %c0_i32_1 = arith.constant 0 : i32
    return %c0_i32, %c0_i32_0 : i32, i32
  }
  func.func @transform_3(%arg0: i32) -> (i32, i32) {
    %c0_i32 = arith.constant 0 : i32
    %c0_i32_0 = arith.constant 0 : i32
    %c0_i32_1 = arith.constant 0 : i32
    return %c0_i32, %c0_i32_0 : i32, i32
  }
  func.func @transform_4(%arg0: i32) -> (i32, i32, i32) {
    %c0_i32 = arith.constant 0 : i32
    %c0_i32_0 = arith.constant 0 : i32
    %c0_i32_1 = arith.constant 0 : i32
    return %arg0, %c0_i32, %c0_i32_0 : i32, i32, i32
  }
}

</mosaic_0001>

<bundles_post_ra>
// kernel: tpu_custom_call.1
= control target key start
LH: loop header
LB: loop body
LE: loop exit
PB: predicated region body
PF: predicated region fallthrough
CT: control target
= control target key end

     0   :  { %9 = vsyncpa [#allocation3], 0  ;;  %s1319_s0 = inlined_call_operand.vmem [shape: f32[256,9], index: 0, kind: input, shape index: {}]   ;;  %s1320_s1 = inlined_call_operand.vmem [shape: f32[144,9], index: 1, kind: input, shape index: {}]   ;;  %s1321_s2 = inlined_call_operand.vmem [shape: f32[144,128], index: 2, kind: input, shape index: {}]   ;;  %s1322_s3 = inlined_call_operand.vmem [shape: f32[1,17], index: 3, kind: input, shape index: {}]   ;;  %s1323_s4 = inlined_call_operand.hbm [shape: f32[2,1,128], index: 4, kind: output, shape index: {}]  }
   0x1   :  { %11 = vsyncpa [#allocation3 + $0x1], 0  ;;  %s1009_s15 = smov 0   ;;  %s1011_s16 = smov 0  }
   0x2   :  { %s1013_s17 = smov 0   ;;  %s1015_s18 = smov 0  }
   0x3 LB: > { %s693_s19 = sadd.s32 4294967295, %s978_s18   ;;  %s694_s20 = sadd.s32 4294967294, %s978_s18   ;;  %s978_s18 = sphi %s1015_s18, %s1329_s18   ;;  %s974_s17 = sphi %s1013_s17, %s1328_s17   ;;  %s970_s16 = sphi %s1011_s16, %s1327_s16   ;;  %s966_s15 = sphi %s1009_s15, %s1326_s15  }
   0x4   : > { %s1032_s21 = sadd.s32 1, %s978_s18   ;;  %s113_s22 = sadd.s32 1, %s974_s17 }
   0x5   : > { %s110_s23 = ssub.s32 %s978_s18, %s1032_s21  ;;  %p123_p0 = scmp.ne.s32.totalorder %s974_s17, %s970_s16 }
   0x6   : > { %p111_p1 = scmp.eq.s32.totalorder %s110_s23, 0  ;;  %p124_p2 = scmp.eq.s32.totalorder %s693_s19, 1 }
   0x7   : > { %p129_p3 = scmp.ne.s32.totalorder %s970_s16, %s966_s15  ;;  %p130_p4 = scmp.eq.s32.totalorder %s694_s20, 1 }
   0x8   : > { %s1042_s24 = scalar_select %p111_p1, %s974_s17, %s113_s22  }
   0x9   : > { %p1044_p5 = por %p124_p2, %p123_p0  ;;  %p1048_p6 = por %p130_p4, %p129_p3 }
   0xa   : > { %p697_p7 = scmp.ge.s32.totalorder %s978_s18, 1  ;;  %p166_p8 = scmp.lt.s32.totalorder %s978_s18, 3 }
   0xc   : > { %p167_p9 = pnand %p697_p7, %p166_p8 }
   0xd   : > { %s1054_s27 = sshll.u32 (!%p167_p9), %s693_s19, 4  ;;  %s189_s13 = sand.u32 (!%p167_p9), 1, %s970_s16  }
   0xe   : > { %170 = sbr.rel (%p167_p9) target bundleno = 534 (0x216), region = 36  ;;  %p192_p10 = scmp.lt.s32.totalorder (!%p167_p9), %s1054_s27, 31 }
   0xf   : > { %s190_s14 = scalar_lea.vmem (!%p167_p9), [#allocation2], %s189_s13  ;;  %s1284_s23 = scalar_lea.hbm (!%p167_p9), %s1323_s4, %s1054_s27 }
  0x10   : > { %s639_s19 = sshll.u32 (!%p167_p9), %s190_s14, 4  ;;  %s627_s28 = scalar_lea.sflag (!%p167_p9), [#allocation3], %s189_s13  ;;  %s640_s19 = int_to_ptr.vmem [resolvable:$true] %s639_s19 }
  0x11   : > { %s918_s29 = scalar_lea.vmem (!%p167_p9), %s640_s19, 16  ;;  %s983_s30 = smov (!%p167_p9), [#allocation2]  }
  0x12   : > { %p919_p11 = scmp.ne.s32.totalorder (!%p167_p9), %s640_s19, %s918_s29  ;;  %s922_s5 = sshll.u32 (!%p167_p9), %s983_s30, 4  ;;  %s923_s5 = int_to_ptr.vmem [resolvable:$false] %s922_s5 }
  0x13   : > { %vm232_vm0 = vcmask 72704   ;;  %v197_v0 = vld [vmem:[%s1320_s1] sm:$0xff]  ;;  %v207_v1 = vld [vmem:[%s1320_s1 + $0x50] sm:$0xff]  ;;  %s193_s6 = scalar_select %p192_p10, %s1054_s27, 31  ;;  %v198_v18 = vld [vmem:[%s1320_s1 + $0x8] sm:$0xff]  ;;  %v980_v34 = vmov 0.0  }
  0x14   : > { %807 = vmatprep.mubr.msk.f32.mxu0 %vm232_vm0, %v197_v0  ;;  %822 = vmatprep.mubr.msk.f32.mxu1 %vm232_vm0, %v207_v1  ;;  %v208_v19 = vld [vmem:[%s1320_s1 + $0x58] sm:$0xff]  ;;  %v199_v20 = vld [vmem:[%s1320_s1 + $0x10] sm:$0xff]  ;;  %v209_v21 = vld [vmem:[%s1320_s1 + $0x60] sm:$0xff]  ;;  %vm981_vm1 = vmmov 0   ;;  %v982_v36 = vmov 16   ;;  %vm551_vm2 = vcmask 130048   ;;  %p920_p12 = pnand %p919_p11, %p1044_p5  ;;  %p925_p0 = scmp.lt.s32.totalorder %s640_s19, %s923_s5 }
  0x15   : > { %s699_s7 = sshll.u32 %s193_s6, 3  ;;  %v200_v22 = vld [vmem:[%s1320_s1 + $0x18] sm:$0xff]  ;;  %v210_v23 = vld [vmem:[%s1320_s1 + $0x68] sm:$0xff]  ;;  %v201_v24 = vld [vmem:[%s1320_s1 + $0x20] sm:$0xff]  ;;  %915 = vset.pattern.permute.xlu0 %v982_v36  ;;  %s924_s6 = scalar_lea.vmem %s923_s5, 32 }
  0x16   : > { %s1069_s10 = scalar_lea.vmem %s1319_s0, %s699_s7  ;;  %v211_v25 = vld [vmem:[%s1320_s1 + $0x70] sm:$0xff]  ;;  %v202_v26 = vld [vmem:[%s1320_s1 + $0x28] sm:$0xff]  ;;  %v212_v27 = vld [vmem:[%s1320_s1 + $0x78] sm:$0xff]  ;;  %p921_p13 = pneg %p920_p12 }
  0x17   : > { %v231_v2 = vld [vmem:[%s1069_s10 + $0x78] sm:$0xff]  ;;  %v230_v3 = vld [vmem:[%s1069_s10 + $0x70] sm:$0xff]  ;;  %v229_v4 = vld [vmem:[%s1069_s10 + $0x68] sm:$0xff]  ;;  %p926_p1 = scmp.lt.s32.totalorder %s924_s6, %s918_s29 }
  0x18   : > { %775 = vmatprep.subr.msk.mxu0 %vm232_vm0, %v231_v2  ;;  %841 = vmatprep.subr.msk.mxu1 %vm232_vm0, %v231_v2  ;;  %v228_v5 = vld [vmem:[%s1069_s10 + $0x60] sm:$0xff]  ;;  %v227_v6 = vld [vmem:[%s1069_s10 + $0x58] sm:$0xff]  ;;  %v226_v7 = vld [vmem:[%s1069_s10 + $0x50] sm:$0xff] }
  0x19   : > { %776 = vmatpush3.xpose.msk.msra.mxu0 %vm232_vm0, %v231_v2  ;;  %857 = vmatpush3.xpose.msk.msra.mxu1 %vm232_vm0, %v231_v2  ;;  %v225_v8 = vld [vmem:[%s1069_s10 + $0x48] sm:$0xff]  ;;  %v224_v9 = vld [vmem:[%s1069_s10 + $0x40] sm:$0xff]  ;;  %v223_v10 = vld [vmem:[%s1069_s10 + $0x38] sm:$0xff]  ;;  %p927_p2 = por %p926_p1, %p925_p0 }
  0x1a   : > { %777 = vmatprep.subr.msk.mxu0 %vm232_vm0, %v230_v3  ;;  %842 = vmatprep.subr.msk.mxu1 %vm232_vm0, %v230_v3  ;;  %v222_v11 = vld [vmem:[%s1069_s10 + $0x30] sm:$0xff]  ;;  %v221_v12 = vld [vmem:[%s1069_s10 + $0x28] sm:$0xff]  ;;  %v220_v13 = vld [vmem:[%s1069_s10 + $0x20] sm:$0xff] }
  0x1b   : > { %v219_v14 = vld [vmem:[%s1069_s10 + $0x18] sm:$0xff]  ;;  %v218_v15 = vld [vmem:[%s1069_s10 + $0x10] sm:$0xff]  ;;  %v217_v16 = vld [vmem:[%s1069_s10 + $0x8] sm:$0xff]  ;;  %p928_p3 = pnand %p927_p2, %p921_p13 }
  0x1c   : > { %v216_v17 = vld [vmem:[%s1069_s10] sm:$0xff]  ;;  %v203_v28 = vld [vmem:[%s1320_s1 + $0x30] sm:$0xff]  ;;  %v204_v30 = vld [vmem:[%s1320_s1 + $0x38] sm:$0xff] }
  0x1d   : > { %778 = vmatpush3.xpose.msk.msra.mxu0 %vm232_vm0, %v230_v3  ;;  %858 = vmatpush3.xpose.msk.msra.mxu1 %vm232_vm0, %v230_v3  ;;  %v213_v29 = vld [vmem:[%s1320_s1 + $0x80] sm:$0xff]  ;;  %v214_v31 = vld [vmem:[%s1320_s1 + $0x88] sm:$0xff]  ;;  %v495_v43 = vld [vmem:[%s1321_s2 + $0x18] sm:$0xff] }
  0x1e   : > { %779 = vmatprep.subr.msk.mxu0 %vm232_vm0, %v229_v4  ;;  %843 = vmatprep.subr.msk.mxu1 %vm232_vm0, %v229_v4  ;;  %v205_v32 = vld [vmem:[%s1320_s1 + $0x40] sm:$0xff]  ;;  %v206_v33 = vld [vmem:[%s1320_s1 + $0x48] sm:$0xff]  ;;  %v494_v46 = vld [vmem:[%s1321_s2 + $0x10] sm:$0xff] }
  0x1f   : > { %v1220_v35 = vld [vmem:[%s1322_s3] sm:$0x1]  ;;  %v491_v45 = vld [vmem:[%s1321_s2 + $0x8] sm:$0xff]  ;;  %v507_v54 = vld [vmem:[%s1321_s2 + $0x38] sm:$0xff] }
  0x20   : > { %544 = vperm.xlu0 %915, %v1220_v35   ;;  %v501_v48 = vld [vmem:[%s1321_s2 + $0x28] sm:$0xff]  ;;  %v490_v51 = vld [vmem:[%s1321_s2] sm:$0xff]  ;;  %v506_v59 = vld [vmem:[%s1321_s2 + $0x30] sm:$0xff] }
  0x21   : > { %780 = vmatpush3.xpose.msk.msra.mxu0 %vm232_vm0, %v229_v4  ;;  %859 = vmatpush3.xpose.msk.msra.mxu1 %vm232_vm0, %v229_v4  ;;  %v500_v53 = vld [vmem:[%s1321_s2 + $0x20] sm:$0xff]  ;;  %v513_v2 = vld [vmem:[%s1321_s2 + $0x48] sm:$0xff] }
  0x22   : > { %781 = vmatprep.subr.msk.mxu0 %vm232_vm0, %v228_v5  ;;  %844 = vmatprep.subr.msk.mxu1 %vm232_vm0, %v228_v5 }
  0x25   : > { %782 = vmatpush3.xpose.msk.msra.mxu0 %vm232_vm0, %v228_v5  ;;  %860 = vmatpush3.xpose.msk.msra.mxu1 %vm232_vm0, %v228_v5 }
  0x26   : > { %783 = vmatprep.subr.msk.mxu0 %vm232_vm0, %v227_v6  ;;  %845 = vmatprep.subr.msk.mxu1 %vm232_vm0, %v227_v6 }
  0x29   : > { %784 = vmatpush3.xpose.msk.msra.mxu0 %vm232_vm0, %v227_v6  ;;  %861 = vmatpush3.xpose.msk.msra.mxu1 %vm232_vm0, %v227_v6  ;;  %v519_v6 = vld [vmem:[%s1321_s2 + $0x58] sm:$0xff] }
  0x2a   : > { %785 = vmatprep.subr.msk.mxu0 %vm232_vm0, %v226_v7  ;;  %846 = vmatprep.subr.msk.mxu1 %vm232_vm0, %v226_v7 }
  0x2d   : > { %786 = vmatpush3.xpose.msk.msra.mxu0 %vm232_vm0, %v226_v7  ;;  %862 = vmatpush3.xpose.msk.msra.mxu1 %vm232_vm0, %v226_v7 }
  0x2e   : > { %787 = vmatprep.subr.msk.mxu0 %vm232_vm0, %v225_v8  ;;  %847 = vmatprep.subr.msk.mxu1 %vm232_vm0, %v225_v8 }
  0x31   : > { %788 = vmatpush3.xpose.msk.msra.mxu0 %vm232_vm0, %v225_v8  ;;  %863 = vmatpush3.xpose.msk.msra.mxu1 %vm232_vm0, %v225_v8  ;;  %v512_v8 = vld [vmem:[%s1321_s2 + $0x40] sm:$0xff] }
  0x32   : > { %789 = vmatprep.subr.msk.mxu0 %vm232_vm0, %v224_v9  ;;  %848 = vmatprep.subr.msk.mxu1 %vm232_vm0, %v224_v9 }
  0x35   : > { %790 = vmatpush3.xpose.msk.msra.mxu0 %vm232_vm0, %v224_v9  ;;  %864 = vmatpush3.xpose.msk.msra.mxu1 %vm232_vm0, %v224_v9 }
  0x36   : > { %791 = vmatprep.subr.msk.mxu0 %vm232_vm0, %v223_v10  ;;  %849 = vmatprep.subr.msk.mxu1 %vm232_vm0, %v223_v10 }
  0x39   : > { %792 = vmatpush3.xpose.msk.msra.mxu0 %vm232_vm0, %v223_v10  ;;  %865 = vmatpush3.xpose.msk.msra.mxu1 %vm232_vm0, %v223_v10 }
  0x3a   : > { %793 = vmatprep.subr.msk.mxu0 %vm232_vm0, %v222_v11  ;;  %850 = vmatprep.subr.msk.mxu1 %vm232_vm0, %v222_v11 }
  0x3d   : > { %794 = vmatpush3.xpose.msk.msra.mxu0 %vm232_vm0, %v222_v11  ;;  %866 = vmatpush3.xpose.msk.msra.mxu1 %vm232_vm0, %v222_v11 }
  0x3e   : > { %795 = vmatprep.subr.msk.mxu0 %vm232_vm0, %v221_v12  ;;  %851 = vmatprep.subr.msk.mxu1 %vm232_vm0, %v221_v12 }
  0x41   : > { %796 = vmatpush3.xpose.msk.msra.mxu0 %vm232_vm0, %v221_v12  ;;  %867 = vmatpush3.xpose.msk.msra.mxu1 %vm232_vm0, %v221_v12 }
  0x42   : > { %797 = vmatprep.subr.msk.mxu0 %vm232_vm0, %v220_v13  ;;  %852 = vmatprep.subr.msk.mxu1 %vm232_vm0, %v220_v13 }
  0x45   : > { %798 = vmatpush3.xpose.msk.msra.mxu0 %vm232_vm0, %v220_v13  ;;  %868 = vmatpush3.xpose.msk.msra.mxu1 %vm232_vm0, %v220_v13  ;;  %v518_v13 = vld [vmem:[%s1321_s2 + $0x50] sm:$0xff] }
  0x46   : > { %799 = vmatprep.subr.msk.mxu0 %vm232_vm0, %v219_v14  ;;  %853 = vmatprep.subr.msk.mxu1 %vm232_vm0, %v219_v14 }
  0x49   : > { %800 = vmatpush3.xpose.msk.msra.mxu0 %vm232_vm0, %v219_v14  ;;  %869 = vmatpush3.xpose.msk.msra.mxu1 %vm232_vm0, %v219_v14  ;;  %v525_v14 = vld [vmem:[%s1321_s2 + $0x68] sm:$0xff] }
  0x4a   : > { %801 = vmatprep.subr.msk.mxu0 %vm232_vm0, %v218_v15  ;;  %854 = vmatprep.subr.msk.mxu1 %vm232_vm0, %v218_v15 }
  0x4d   : > { %802 = vmatpush3.xpose.msk.msra.mxu0 %vm232_vm0, %v218_v15  ;;  %870 = vmatpush3.xpose.msk.msra.mxu1 %vm232_vm0, %v218_v15 }
  0x4e   : > { %803 = vmatprep.subr.msk.mxu0 %vm232_vm0, %v217_v16  ;;  %855 = vmatprep.subr.msk.mxu1 %vm232_vm0, %v217_v16 }
  0x51   : > { %804 = vmatpush3.xpose.msk.msra.mxu0 %vm232_vm0, %v217_v16  ;;  %871 = vmatpush3.xpose.msk.msra.mxu1 %vm232_vm0, %v217_v16 }
  0x52   : > { %805 = vmatprep.subr.msk.mxu0 %vm232_vm0, %v216_v17  ;;  %856 = vmatprep.subr.msk.mxu1 %vm232_vm0, %v216_v17 }
  0x55   : > { %806 = vmatpush3.xpose.msk.msra.mxu0 %vm232_vm0, %v216_v17  ;;  %872 = vmatpush3.xpose.msk.msra.mxu1 %vm232_vm0, %v216_v17 }
  0x56   : > { %834 = vmatprep.subr.mxu1 %v980_v34 }
  0x58   : > { %808 = vmatmul.mubr.msk.f32.vlgmr.msra.gmra.mxu0 %vm232_vm0, %v198_v18  ;;  %823 = vmatmul.mubr.msk.f32.vlgmr.msra.gmra.mxu1 %vm232_vm0, %v208_v19  ;;  %v524_v19 = vld [vmem:[%s1321_s2 + $0x60] sm:$0xff] }
  0x59   : > { %810 = vmatprep.mubr.msk.f32.mxu0 %vm232_vm0, %v199_v20  ;;  %825 = vmatprep.mubr.msk.f32.mxu1 %vm232_vm0, %v209_v21  ;;  %v531_v21 = vld [vmem:[%s1321_s2 + $0x78] sm:$0xff] }
  0x5c   : > { %811 = vmatmul.mubr.msk.f32.gmra.mxu0 %vm232_vm0, %v200_v22  ;;  %826 = vmatmul.mubr.msk.f32.gmra.mxu1 %vm232_vm0, %v210_v23  ;;  %v537_v23 = vld [vmem:[%s1321_s2 + $0x88] sm:$0xff] }
  0x5d   : > { %813 = vmatprep.mubr.msk.f32.mxu0 %vm232_vm0, %v201_v24  ;;  %828 = vmatprep.mubr.msk.f32.mxu1 %vm232_vm0, %v211_v25 }
  0x60   : > { %814 = vmatmul.mubr.msk.f32.gmra.mxu0 %vm232_vm0, %v202_v26  ;;  %829 = vmatmul.mubr.msk.f32.gmra.mxu1 %vm232_vm0, %v212_v27 }
  0x61   : > { %816 = vmatprep.mubr.msk.f32.mxu0 %vm232_vm0, %v203_v28  ;;  %831 = vmatprep.mubr.msk.f32.mxu1 %vm232_vm0, %v213_v29  ;;  %v530_v29 = vld [vmem:[%s1321_s2 + $0x70] sm:$0xff] }
  0x64   : > { %817 = vmatmul.mubr.msk.f32.gmra.mxu0 %vm232_vm0, %v204_v30  ;;  %832 = vmatmul.mubr.msk.f32.gmra.mxu1 %vm232_vm0, %v214_v31 }
  0x65   : > { %819 = vmatprep.mubr.msk.f32.mxu0 %vm232_vm0, %v205_v32  ;;  %838 = vmatprep.mubr.msk.f32.mxu1 %vm981_vm1, %v980_v34 }
  0x68   : > { %820 = vmatmul.mubr.msk.f32.gmra.mxu0 %vm232_vm0, %v206_v33 }
 0x118   : > { %v809_v37 = vpop.f32.mrf.mxu0  ;;  %v824_v38 = vpop.f32.mrf.mxu1 }
 0x119   : > { %v493_v55 = vadd.f32 %v809_v37, %v491_v45  ;;  %v521_v16 = vadd.f32 %v824_v38, %v519_v6  ;;  %v536_v37 = vld [vmem:[%s1321_s2 + $0x80] sm:$0xff]  ;;  %v547_v45 = vlaneseq }
 0x11a   : > { %v401_v39 = vpop.f32.mrf.mxu0  ;;  %v451_v40 = vpop.f32.mrf.mxu1 }
 0x11b   : > { %v492_v61 = vadd.f32 %v490_v51, %v401_v39  ;;  %v520_v24 = vadd.f32 %v518_v13, %v451_v40 }
 0x11c   : > { %v812_v41 = vpop.f32.mrf.mxu0  ;;  %v827_v42 = vpop.f32.mrf.mxu1 }
 0x11d   : > { %v497_v50 = vadd.f32 %v812_v41, %v495_v43  ;;  %v527_v25 = vadd.f32 %v827_v42, %v525_v14 }
 0x11e   : > { %v411_v44 = vpop.f32.mrf.mxu0  ;;  %v461_v49 = vpop.f32.mrf.mxu1 }
 0x11f   : > { %v496_v56 = vadd.f32 %v494_v46, %v411_v44  ;;  %v499_v62 = vmul.f32 %v497_v50, %v493_v55  ;;  %v526_v28 = vadd.f32 %v524_v19, %v461_v49  ;;  %v548_v46 = vshrl.u32 %v547_v45, 7 }
 0x120   : > { %v815_v47 = vpop.f32.mrf.mxu0  ;;  %v830_v60 = vpop.f32.mrf.mxu1 }
 0x121   : > { %v503_v57 = vadd.f32 %v815_v47, %v501_v48  ;;  %v498_v3 = vmul.f32 %v496_v56, %v492_v61  ;;  %v533_v32 = vadd.f32 %v830_v60, %v531_v21  ;;  %v549_v47 = vsub.s32 0, %v548_v46  ;;  %v545_v48 = vpop.permute.xlu0 %544 }
 0x122   : > { %v421_v52 = vpop.f32.mrf.mxu0  ;;  %v471_v9 = vpop.f32.mrf.mxu1 }
 0x123   : > { %v502_v63 = vadd.f32 %v500_v53, %v421_v52  ;;  %v505_v4 = vmul.f32 %v503_v57, %v499_v62  ;;  %v532_v40 = vadd.f32 %v530_v29, %v471_v9  ;;  %v550_v49 = vrot.slane %v545_v48, %v549_v47 }
 0x124   : > { %v818_v58 = vpop.f32.mrf.mxu0  ;;  %v833_v22 = vpop.f32.mrf.mxu1 }
 0x125   : > { %v509_v0 = vadd.f32 %v818_v58, %v507_v54  ;;  %v504_v10 = vmul.f32 %v502_v63, %v498_v3  ;;  %v539_v33 = vadd.f32 %v833_v22, %v537_v23 }
 0x126   : > { %v431_v1 = vpop.f32.mrf.mxu0  ;;  %v481_v36 = vpop.f32.mrf.mxu1 }
 0x127   : > { %v508_v5 = vadd.f32 %v506_v59, %v431_v1  ;;  %v511_v11 = vmul.f32 %v509_v0, %v505_v4  ;;  %v538_v43 = vadd.f32 %v536_v37, %v481_v36 }
 0x128   : > { %v821_v7 = vpop.f32.mrf.mxu0 }
 0x129   : > { %v515_v12 = vadd.f32 %v821_v7, %v513_v2  ;;  %v510_v17 = vmul.f32 %v508_v5, %v504_v10 }
 0x12a   : > { %v441_v15 = vpop.f32.mrf.mxu0 }
 0x12b   : > { %v517_v18 = vmul.f32 %v515_v12, %v511_v11  ;;  %v514_v20 = vadd.f32 %v512_v8, %v441_v15 }
 0x12d   : > { %v523_v26 = vmul.f32 %v521_v16, %v517_v18  ;;  %v516_v27 = vmul.f32 %v514_v20, %v510_v17 }
 0x12f   : > { %v522_v30 = vmul.f32 %v520_v24, %v516_v27  ;;  %v529_v31 = vmul.f32 %v527_v25, %v523_v26 }
 0x131   : > { %v535_v38 = vmul.f32 %v533_v32, %v529_v31  ;;  %v528_v39 = vmul.f32 %v526_v28, %v522_v30 }
 0x133   : > { %v534_v41 = vmul.f32 %v532_v40, %v528_v39  ;;  %v541_v42 = vmul.f32 %v539_v33, %v535_v38 }
 0x135   : > { %v540_v44 = vmul.f32 %v538_v43, %v534_v41  ;;  %835 = vmatpush3.msra.mxu1 %v541_v42 }
 0x136   : > { %836 = vmatprep.subr.mxu1 %v980_v34 }
 0x137   : > { %837 = vmatpush3.msra.mxu1 %v540_v44 }
 0x138   : > { %839 = vmatmul.mubr.msk.f32.vlgmr.msra.gmra.mxu1 %vm551_vm2, %v1220_v35 }
 0x1f8   : > { %v620_v50 = vpop.f32.mrf.mxu1 }
 0x1f9   : > { %v621_v51 = vadd.f32 %v620_v50, %v550_v49 }
 0x1fa   : > { %v840_v52 = vpop.f32.mrf.mxu1 }
 0x1fb   : > { %916 = vtanh.f32 %v621_v51 }
 0x208   : > { %v917_v34 = vpop.eup %916 }
 0x209   : > { %625 = vst [vmem:[%s190_s14] sm:$0x1] %v917_v34 }
 0x20a   : > { %931 = shalt.err (!%p928_p3)
}
 0x20b   : > { %s932_s27 = scalar_lea.hbm %s1284_s23, 16  ;;  %s936_s9 = scalar_lea.hbm %s1323_s4, 32 }
 0x20c   : > { %p933_p4 = scmp.ne.s32.totalorder %s1284_s23, %s932_s27  ;;  %p937_p9 = scmp.lt.s32.totalorder %s1284_s23, %s1323_s4 }
 0x20d   : > { %p938_p10 = scmp.lt.s32.totalorder %s936_s9, %s932_s27 }
 0x20e   : > { %p934_p7 = pnand %p933_p4, %p1044_p5 }
 0x20f   : > { %p939_p11 = por %p938_p10, %p937_p9 }
 0x210   : > { %p935_p8 = pneg %p934_p7 }
 0x212   : > { %p940_p12 = pnand %p939_p11, %p935_p8 }
 0x214   : > { %943 = shalt.err (!%p940_p12)
}
 0x215   : > { %873 = dma.vmem_to_hbm [thread:$0]  (%p1044_p5), %s640_s19, 16, %s1284_s23, %s627_s28  }
 0x216 PF: > { %p879_p13 = scmp.ge.s32.totalorder %s978_s18, 2  ;;  %s651_s12 = sand.u32 1, %s966_s15  }
 0x217   : > { %s652_s13 = scalar_lea.sflag [#allocation3], %s651_s12 }
 0x218   : > { %p876_p0 = pnand %p879_p13, %p1048_p6 }
 0x21a   : > { %p877_p1 = pneg %p876_p0 }
 0x21c   : > { %961 = dma.done.wait (%p877_p1), %s652_s13, 16  }
 0x21d   : > { %963 = vsyncadd (%p877_p1), %s652_s13, 4294967280  ;;  %p14_p2 = scmp.ge.s32.totalorder %s1032_s21, 4   ;;  %s1326_s15 = smov %s970_s16 }
 0x21e   : > { %s1327_s16 = smov %s974_s17  ;;  %s1328_s17 = smov %s1042_s24 }
 0x21f   : > { %s1329_s18 = smov %s1032_s21  ;;  %16 = sbr.rel (!%p14_p2) target bundleno = 3 (0x3), region = 71 }
 0x224   :  { %656 = vsyncpa [#allocation3], 1 }
 0x225   :  { %658 = vsyncpa [#allocation3 + $0x1], 1 }

</bundles_post_ra>
